<compile_context>
chip_gen: v6e
topology: v6e:2x2x1
jax: 0.10.0
libtpu: 0.0.40
codegen_flags: <defaults>
</compile_context>

<pallas_src>
import math
import functools

import jax
import jax.numpy as jnp
from jax.experimental import pallas as pl
from jax.experimental.pallas import tpu as pltpu


def _gelu_exact(x):
    # Matches torch.nn.GELU() default (exact erf-based formulation).
    return 0.5 * x * (1.0 + jax.lax.erf(x * (1.0 / math.sqrt(2.0))))


def _round_up(x, m):
    return pl.cdiv(x, m) * m


def _chip_defaults():
    """Return (tm, th, vmem_limit_bytes) tuned per TPU generation."""
    vmem_cap = None
    try:
        info = pltpu.get_tpu_info()
        vmem_cap = int(getattr(info, "vmem_capacity_bytes"))
    except Exception:
        vmem_cap = None
    if vmem_cap is None:
        try:
            kind = jax.devices()[0].device_kind.lower()
            vmem_cap = (64 if "v7" in kind else 128) * 1024 * 1024
        except Exception:
            vmem_cap = 64 * 1024 * 1024  # conservative
    if vmem_cap >= 128 * 1024 * 1024:
        # v5e / v6e: big row tile to push arithmetic intensity past the weight-streaming
        # roofline crossover; plenty of physical VMEM to hold it.
        return 768, 1024, 100 * 1024 * 1024
    # v7x: 64 MiB physical VMEM -> smaller tile and explicit headroom for double-buffers.
    return 512, 512, 52 * 1024 * 1024


# ---------------------------------------------------------------------------
# Kernels
# ---------------------------------------------------------------------------

def ffn_kernel_resident(x_ref, w1_ref, b1_ref, w2_ref, b2_ref, o_ref):
    # Full W1/W2 resident in VMEM (constant index maps): one step does the whole H contraction.
    h = jnp.dot(x_ref[...], w1_ref[...], preferred_element_type=jnp.float32)
    h = _gelu_exact(h + b1_ref[...])
    y = jnp.dot(h.astype(w2_ref.dtype), w2_ref[...], preferred_element_type=jnp.float32)
    o_ref[...] = (y + b2_ref[...]).astype(o_ref.dtype)


def ffn_kernel_chunked_f32out(x_ref, w1_ref, b1_ref, w2_ref, b2_ref, o_ref):
    # f32 output block is resident across the hidden (j) axis -> accumulate directly into it
    # (saves the tm*C*4-byte scratch). Seed with the output bias at j == 0.
    j = pl.program_id(1)

    @pl.when(j == 0)
    def _seed():
        o_ref[...] = jnp.broadcast_to(b2_ref[...], o_ref.shape)

    h = jnp.dot(x_ref[...], w1_ref[...], preferred_element_type=jnp.float32)
    h = _gelu_exact(h + b1_ref[...])
    o_ref[...] += jnp.dot(h.astype(w2_ref.dtype), w2_ref[...],
                          preferred_element_type=jnp.float32)


def ffn_kernel_chunked_acc(x_ref, w1_ref, b1_ref, w2_ref, b2_ref, o_ref, acc_ref):
    # Narrow (e.g. bf16) output: keep an f32 accumulator scratch, cast once at finalize.
    j = pl.program_id(1)

    @pl.when(j == 0)
    def _init():
        acc_ref[...] = jnp.zeros_like(acc_ref)

    h = jnp.dot(x_ref[...], w1_ref[...], preferred_element_type=jnp.float32)
    h = _gelu_exact(h + b1_ref[...])
    acc_ref[...] += jnp.dot(h.astype(w2_ref.dtype), w2_ref[...],
                            preferred_element_type=jnp.float32)

    @pl.when(j == pl.num_programs(1) - 1)
    def _finalize():
        # nn.Dropout is identity in eval/inference mode -> no masking.
        o_ref[...] = (acc_ref[...] + b2_ref[...]).astype(o_ref.dtype)


# ---------------------------------------------------------------------------
# Wrapper
# ---------------------------------------------------------------------------

@functools.partial(
    jax.jit,
    static_argnames=("tm", "th", "vmem_limit_bytes", "compute_dtype",
                     "weights_resident", "out_dtype"))
def _feed_forward_impl(x, w1, b1, w2, b2, *, tm, th, vmem_limit_bytes,
                       compute_dtype, weights_resident, out_dtype):
    B, T, C = x.shape
    H = w1.shape[1]  # 4*C
    M = B * T
    out_dtype = x.dtype if out_dtype is None else out_dtype

    # Row tile: multiple of 16 (bf16 sublane packing); split into >= 2 tiles when M allows
    # so both v7x TensorCores get work along the "parallel" M axis.
    tm_eff = min(tm, _round_up(M, 16))
    if pl.cdiv(M, tm_eff) == 1 and M > 16:
        tm_eff = _round_up(pl.cdiv(M, 2), 16)
    M_pad = _round_up(M, tm_eff)

    # Decide whether W1/W2 stay fully VMEM-resident (<= 1/3 of the VMEM budget).
    weight_bytes = 2 * C * H * jnp.dtype(compute_dtype).itemsize
    if weights_resident is None:
        weights_resident = 3 * weight_bytes <= vmem_limit_bytes

    x2d = x.reshape(M, C).astype(compute_dtype)
    if M_pad != M:
        x2d = jnp.pad(x2d, ((0, M_pad - M), (0, 0)))

    # No-op casts when weights are already stored in compute_dtype (preferred usage).
    w1c = w1.astype(compute_dtype)
    w2c = w2.astype(compute_dtype)
    b1_2d = b1.reshape(1, H).astype(jnp.float32)
    b2_2d = b2.reshape(1, C).astype(jnp.float32)

    if weights_resident:
        grid = (M_pad // tm_eff,)
        out2d = pl.pallas_call(
            ffn_kernel_resident,
            out_shape=jax.ShapeDtypeStruct((M_pad, C), out_dtype),
            grid_spec=pltpu.PrefetchScalarGridSpec(
                num_scalar_prefetch=0,
                grid=grid,
                in_specs=[
                    pl.BlockSpec((tm_eff, C), lambda i: (i, 0)),  # x rows
                    pl.BlockSpec((C, H), lambda i: (0, 0)),       # W1 (resident)
                    pl.BlockSpec((1, H), lambda i: (0, 0)),       # b1
                    pl.BlockSpec((H, C), lambda i: (0, 0)),       # W2 (resident)
                    pl.BlockSpec((1, C), lambda i: (0, 0)),       # b2
                ],
                out_specs=pl.BlockSpec((tm_eff, C), lambda i: (i, 0)),
            ),
            compiler_params=pltpu.CompilerParams(
                dimension_semantics=("parallel",),
                vmem_limit_bytes=vmem_limit_bytes,
            ),
        )(x2d, w1c, b1_2d, w2c, b2_2d)
    else:
        # Hidden dim chunked on a second ("arbitrary") grid axis.
        th_eff = H if H <= th else th
        H_pad = _round_up(H, th_eff)
        if H_pad != H:
            # Zero-padded hidden units contribute gelu(0)*0 == 0, so padding is exact.
            w1c = jnp.pad(w1c, ((0, 0), (0, H_pad - H)))
            w2c = jnp.pad(w2c, ((0, H_pad - H), (0, 0)))
            b1_2d = jnp.pad(b1_2d, ((0, 0), (0, H_pad - H)))
        grid = (M_pad // tm_eff, H_pad // th_eff)

        f32_out = jnp.dtype(out_dtype) == jnp.dtype(jnp.float32)
        kernel = ffn_kernel_chunked_f32out if f32_out else ffn_kernel_chunked_acc
        scratch = [] if f32_out else [pltpu.VMEM((tm_eff, C), jnp.float32)]

        out2d = pl.pallas_call(
            kernel,
            out_shape=jax.ShapeDtypeStruct((M_pad, C), out_dtype),
            grid_spec=pltpu.PrefetchScalarGridSpec(
                num_scalar_prefetch=0,
                grid=grid,
                in_specs=[
                    pl.BlockSpec((tm_eff, C), lambda i, j: (i, 0)),  # x rows
                    pl.BlockSpec((C, th_eff), lambda i, j: (0, j)),  # W1 hidden-chunk
                    pl.BlockSpec((1, th_eff), lambda i, j: (0, j)),  # b1 hidden-chunk
                    pl.BlockSpec((th_eff, C), lambda i, j: (j, 0)),  # W2 hidden-chunk
                    pl.BlockSpec((1, C), lambda i, j: (0, 0)),       # b2
                ],
                out_specs=pl.BlockSpec((tm_eff, C), lambda i, j: (i, 0)),
                scratch_shapes=scratch,
            ),
            compiler_params=pltpu.CompilerParams(
                dimension_semantics=("parallel", "arbitrary"),
                vmem_limit_bytes=vmem_limit_bytes,
            ),
        )(x2d, w1c, b1_2d, w2c, b2_2d)

    if M_pad != M:
        out2d = out2d[:M]
    return out2d.reshape(B, T, C)


def feed_forward(x, w1, b1, w2, b2, *, tm=None, th=None, vmem_limit_bytes=None,
                 compute_dtype=jnp.bfloat16, weights_resident=None, out_dtype=None):
    """x: (B, T, C). w1: (C, 4C), b1: (4C,), w2: (4C, C), b2: (C,). Returns (B, T, C)."""
    d_tm, d_th, d_vmem = _chip_defaults()
    return _feed_forward_impl(
        x, w1, b1, w2, b2,
        tm=d_tm if tm is None else tm,
        th=d_th if th is None else th,
        vmem_limit_bytes=d_vmem if vmem_limit_bytes is None else vmem_limit_bytes,
        compute_dtype=compute_dtype,
        weights_resident=weights_resident,
        out_dtype=out_dtype,
    )


def init_params(key, n_embd, bias=True):
    """Synthetic init mirroring nn.Linear shapes.
    PyTorch: linear1.weight (4C, C), linear2.weight (C, 4C) -> stored transposed."""
    k1, k2, k3, k4 = jax.random.split(key, 4)
    H = 4 * n_embd
    lim1 = 1.0 / math.sqrt(n_embd)
    lim2 = 1.0 / math.sqrt(H)
    w1 = jax.random.uniform(k1, (n_embd, H), jnp.float32, -lim1, lim1)
    w2 = jax.random.uniform(k2, (H, n_embd), jnp.float32, -lim2, lim2)
    if bias:
        b1 = jax.random.uniform(k3, (H,), jnp.float32, -lim1, lim1)
        b2 = jax.random.uniform(k4, (n_embd,), jnp.float32, -lim2, lim2)
    else:
        b1 = jnp.zeros((H,), jnp.float32)
        b2 = jnp.zeros((n_embd,), jnp.float32)
    return w1, b1, w2, b2


if __name__ == "__main__":
    key = jax.random.PRNGKey(0)
    # Small shapes chosen to exercise: M not a multiple of the tile (tail padding),
    # multiple M tiles, and (forced) multiple H chunks for the accumulator path.
    B, T, n_embd = 2, 25, 64          # M = 50 rows, hidden = 4*n_embd = 256

    kx, kp = jax.random.split(key)
    x = jax.random.normal(kx, (B, T, n_embd), jnp.float32)
    w1, b1, w2, b2 = init_params(kp, n_embd, bias=True)

    # Pre-cast weights to bf16 ONCE outside the jitted hot path (perf feedback: avoids a
    # per-call f32->bf16 cast that re-reads all weights from HBM before the kernel runs).
    w1_bf = w1.astype(jnp.bfloat16)
    w2_bf = w2.astype(jnp.bfloat16)

    # Pure-JAX reference following the same bf16-input / f32-accumulate precision path.
    xr = x.reshape(-1, n_embd).astype(jnp.bfloat16).astype(jnp.float32)
    w1r = w1_bf.astype(jnp.float32)
    w2r = w2_bf.astype(jnp.float32)
    hr = _gelu_exact(xr @ w1r + b1)
    hr = hr.astype(jnp.bfloat16).astype(jnp.float32)
    ref = (hr @ w2r + b2).reshape(B, T, n_embd)

    # 1) Default path: weights fully VMEM-resident, single grid axis over rows.
    out_res = jax.block_until_ready(feed_forward(x, w1_bf, b1, w2_bf, b2))
    assert out_res.shape == (B, T, n_embd)
    assert jnp.allclose(out_res, ref, atol=1e-2, rtol=1e-2), "resident path mismatch"

    # 2) Chunked-H path (f32 output accumulated directly in the resident output block).
    out_chunk = jax.block_until_ready(
        feed_forward(x, w1_bf, b1, w2_bf, b2, th=128, weights_resident=False))
    assert jnp.allclose(out_chunk, ref, atol=1e-2, rtol=1e-2), "chunked f32 path mismatch"

    # 3) Chunked-H path with bf16 output (f32 accumulator scratch, cast at finalize).
    out_bf = jax.block_until_ready(
        feed_forward(x, w1_bf, b1, w2_bf, b2, th=128, weights_resident=False,
                     out_dtype=jnp.bfloat16))
    assert jnp.allclose(out_bf.astype(jnp.float32), ref, atol=3e-2, rtol=3e-2), \
        "chunked bf16 path mismatch"

    # TODO(synk): nn.Dropout training-mode RNG masking not implemented (identity in eval).
    print("KERNEL_OK")
</pallas_src>

<mosaic_0001>
module attributes {stable_mosaic.version = 11 : i64} {
  func.func @ffn_kernel_resident(%arg0: i32, %arg1: memref<32x64xbf16, #tpu.memory_space<vmem>>, %arg2: memref<64x256xbf16, #tpu.memory_space<vmem>>, %arg3: memref<1x256xf32, #tpu.memory_space<vmem>>, %arg4: memref<256x64xbf16, #tpu.memory_space<vmem>>, %arg5: memref<1x64xf32, #tpu.memory_space<vmem>>, %arg6: memref<32x64xf32, #tpu.memory_space<vmem>>) attributes {dimension_semantics = [#tpu.dimension_semantics<parallel>], iteration_bounds = array<i64: 2>, scalar_prefetch = 0 : i64, scratch_operands = 0 : i64, tpu.core_type = #tpu.core_type<tc>, window_params = [{transform_indices = @transform_0, window_bounds = array<i64: 32, 64>}, {pipeline_mode = #tpu.pipeline_mode<synchronous>, transform_indices = @transform_1, window_bounds = array<i64: 64, 256>}, {pipeline_mode = #tpu.pipeline_mode<synchronous>, transform_indices = @transform_2, window_bounds = array<i64: 1, 256>}, {pipeline_mode = #tpu.pipeline_mode<synchronous>, transform_indices = @transform_3, window_bounds = array<i64: 256, 64>}, {pipeline_mode = #tpu.pipeline_mode<synchronous>, transform_indices = @transform_4, window_bounds = array<i64: 1, 64>}, {transform_indices = @transform_5, window_bounds = array<i64: 32, 64>}]} {
    %c0 = arith.constant 0 : index
    %c0_0 = arith.constant 0 : index
    %0 = vector.load %arg1[%c0, %c0_0] : memref<32x64xbf16, #tpu.memory_space<vmem>>, vector<32x64xbf16>
    %c0_1 = arith.constant 0 : index
    %c0_2 = arith.constant 0 : index
    %1 = vector.load %arg2[%c0_1, %c0_2] : memref<64x256xbf16, #tpu.memory_space<vmem>>, vector<64x256xbf16>
    %cst = arith.constant dense<0.000000e+00> : vector<32x256xf32>
    %2 = tpu.matmul %0, %1, %cst {dimension_numbers = #tpu.dot_dimension_numbers<[1], [0], [0], [1], [0, 0, 1, 1], [], []>} : vector<32x64xbf16>, vector<64x256xbf16>, vector<32x256xf32> -> vector<32x256xf32>
    %c0_3 = arith.constant 0 : index
    %c0_4 = arith.constant 0 : index
    %3 = vector.load %arg3[%c0_3, %c0_4] : memref<1x256xf32, #tpu.memory_space<vmem>>, vector<1x256xf32>
    %4 = vector.broadcast %3 : vector<1x256xf32> to vector<32x256xf32>
    %5 = arith.addf %2, %4 : vector<32x256xf32>
    %cst_5 = arith.constant 5.000000e-01 : f32
    %6 = vector.broadcast %cst_5 : f32 to vector<32x256xf32>
    %7 = arith.mulf %6, %5 : vector<32x256xf32>
    %cst_6 = arith.constant 0.707106769 : f32
    %8 = vector.broadcast %cst_6 : f32 to vector<32x256xf32>
    %9 = arith.mulf %5, %8 : vector<32x256xf32>
    %10 = math.erf %9 : vector<32x256xf32>
    %cst_7 = arith.constant 1.000000e+00 : f32
    %11 = vector.broadcast %cst_7 : f32 to vector<32x256xf32>
    %12 = arith.addf %11, %10 : vector<32x256xf32>
    %13 = arith.mulf %7, %12 : vector<32x256xf32>
    %14 = arith.truncf %13 : vector<32x256xf32> to vector<32x256xbf16>
    %c0_8 = arith.constant 0 : index
    %c0_9 = arith.constant 0 : index
    %15 = vector.load %arg4[%c0_8, %c0_9] : memref<256x64xbf16, #tpu.memory_space<vmem>>, vector<256x64xbf16>
    %cst_10 = arith.constant dense<0.000000e+00> : vector<32x64xf32>
    %16 = tpu.matmul %14, %15, %cst_10 {dimension_numbers = #tpu.dot_dimension_numbers<[1], [0], [0], [1], [0, 0, 1, 1], [], []>} : vector<32x256xbf16>, vector<256x64xbf16>, vector<32x64xf32> -> vector<32x64xf32>
    %c0_11 = arith.constant 0 : index
    %c0_12 = arith.constant 0 : index
    %17 = vector.load %arg5[%c0_11, %c0_12] : memref<1x64xf32, #tpu.memory_space<vmem>>, vector<1x64xf32>
    %18 = vector.broadcast %17 : vector<1x64xf32> to vector<32x64xf32>
    %19 = arith.addf %16, %18 : vector<32x64xf32>
    %c0_13 = arith.constant 0 : index
    %c0_14 = arith.constant 0 : index
    %20 = vector.load %arg6[%c0_13, %c0_14] : memref<32x64xf32, #tpu.memory_space<vmem>>, vector<32x64xf32>
    tpu.vector_store %arg6[%c0_13, %c0_14], %19 {strides = array<i32>} : memref<32x64xf32, #tpu.memory_space<vmem>>, vector<32x64xf32>,
    return
  }
  func.func @transform_0(%arg0: i32) -> (i32, i32) {
    %c0_i32 = arith.constant 0 : i32
    %c0_i32_0 = arith.constant 0 : i32
    return %arg0, %c0_i32 : i32, i32
  }
  func.func @transform_1(%arg0: i32) -> (i32, i32) {
    %c0_i32 = arith.constant 0 : i32
    %c0_i32_0 = arith.constant 0 : i32
    %c0_i32_1 = arith.constant 0 : i32
    return %c0_i32, %c0_i32_0 : i32, i32
  }
  func.func @transform_2(%arg0: i32) -> (i32, i32) {
    %c0_i32 = arith.constant 0 : i32
    %c0_i32_0 = arith.constant 0 : i32
    %c0_i32_1 = arith.constant 0 : i32
    return %c0_i32, %c0_i32_0 : i32, i32
  }
  func.func @transform_3(%arg0: i32) -> (i32, i32) {
    %c0_i32 = arith.constant 0 : i32
    %c0_i32_0 = arith.constant 0 : i32
    %c0_i32_1 = arith.constant 0 : i32
    return %c0_i32, %c0_i32_0 : i32, i32
  }
  func.func @transform_4(%arg0: i32) -> (i32, i32) {
    %c0_i32 = arith.constant 0 : i32
    %c0_i32_0 = arith.constant 0 : i32
    %c0_i32_1 = arith.constant 0 : i32
    return %c0_i32, %c0_i32_0 : i32, i32
  }
  func.func @transform_5(%arg0: i32) -> (i32, i32) {
    %c0_i32 = arith.constant 0 : i32
    %c0_i32_0 = arith.constant 0 : i32
    return %arg0, %c0_i32 : i32, i32
  }
}

</mosaic_0001>

<bundles_post_ra>
// kernel: _feed_forward_impl.1
= control target key start
LH: loop header
LB: loop body
LE: loop exit
PB: predicated region body
PF: predicated region fallthrough
CT: control target
= control target key end

     0   :  { %s813_s18 = smov 0   ;;  %s918_s0 = inlined_call_operand.vmem [shape: bf16[64,64], index: 0, kind: input, shape index: {}]   ;;  %s919_s1 = inlined_call_operand.vmem [shape: bf16[64,256], index: 1, kind: input, shape index: {}]   ;;  %s920_s2 = inlined_call_operand.vmem [shape: f32[1,256], index: 2, kind: input, shape index: {}]   ;;  %s921_s3 = inlined_call_operand.vmem [shape: bf16[256,64], index: 3, kind: input, shape index: {}]   ;;  %s922_s4 = inlined_call_operand.vmem [shape: f32[1,64], index: 4, kind: input, shape index: {}]   ;;  %s923_s5 = inlined_call_operand.vmem [shape: f32[64,64], index: 5, kind: output, shape index: {}]  }
   0x1 LB: > { %s651_s19 = sadd.s32 4294967295, %s780_s18   ;;  %p655_p0 = scmp.ge.s32.totalorder %s780_s18, 1  ;;  %s780_s18 = sphi %s813_s18, %s15_s18  }
   0x2   : > { %p188_p1 = scmp.lt.s32.totalorder %s780_s18, 3 }
   0x4   : > { %p189_p2 = pnand %p655_p0, %p188_p1 }
   0x5   : > { %s656_s22 = sshll.u32 (!%p189_p2), %s651_s19, 2 }
   0x6   : > { %192 = sbr.rel (%p189_p2) target bundleno = 464 (0x1d0), region = 40  ;;  %p217_p3 = scmp.lt.s32.totalorder (!%p189_p2), %s656_s22, 7 }
   0xb   : > { %v728_v0 = vld [vmem:[%s919_s1 + $0x34] ss:$8 sps:$4 sm:$0xff]   ;;  %v730_v1 = vld [vmem:[%s919_s1 + $0x30] ss:$8 sps:$4 sm:$0xff]   ;;  %v782_v2 = vmov 0   ;;  %s925_s22 = smov (!%p217_p3, %s656_s22), 7  ;;  %v243_v27 = vlaneseq }
   0xc   : > { %342 = vmatprep.mubr.bf16.mxu0 %v782_v2  ;;  %318 = vmatprep.subr.bf16.mxu0 %v728_v0  ;;  %v731_v3 = vld [vmem:[%s919_s1 + $0x24] ss:$8 sps:$4 sm:$0xff]   ;;  %v733_v4 = vld [vmem:[%s919_s1 + $0x20] ss:$8 sps:$4 sm:$0xff]   ;;  %v734_v5 = vld [vmem:[%s919_s1 + $0x14] ss:$8 sps:$4 sm:$0xff]  }
   0xd   : > { %319 = vmatpush1.bf16.msra.mxu0 %v730_v1  ;;  %s657_s6 = sshll.u32 %s925_s22, 2  ;;  %v736_v6 = vld [vmem:[%s919_s1 + $0x10] ss:$8 sps:$4 sm:$0xff]   ;;  %vm303_vm0 = vcmask 523264   ;;  %v737_v7 = vld [vmem:[%s919_s1 + $0x4] ss:$8 sps:$4 sm:$0xff]  }
   0xe   : > { %320 = vmatprep.subr.bf16.mxu0 %v731_v3  ;;  %s220_s9 = scalar_lea.vmem %s918_s0, %s657_s6  ;;  %v739_v8 = vld [vmem:[%s919_s1] ss:$8 sps:$4 sm:$0xff]   ;;  %v742_v11 = vld [vmem:[%s921_s3 + $0x78] sm:$0xff]   ;;  %v744_v13 = vld [vmem:[%s921_s3 + $0x70] sm:$0xff]   ;;  %v244_v28 = vshrl.u32 %v243_v27, 7  ;;  %s659_s29 = sshll.u32 %s925_s22, 3 }
   0xf   : > { %v740_v9 = vld [vmem:[%s220_s9] sm:$0xff]   ;;  %v741_v10 = vld [vmem:[%s220_s9 + $0x8] sm:$0xff]   ;;  %v743_v12 = vld [vmem:[%s921_s3 + $0x38] sm:$0xff]   ;;  %691 = vmatprep.subr.bf16.mxu1 %v742_v11  ;;  %s226_s9 = scalar_lea.vmem %s923_s5, %s659_s29 }
  0x10   : > { %692 = vmatpush3.bf16.msra.mxu1 %v743_v12  ;;  %v745_v14 = vld [vmem:[%s921_s3 + $0x30] sm:$0xff]   ;;  %v746_v15 = vld [vmem:[%s921_s3 + $0x68] sm:$0xff]   ;;  %v748_v17 = vld [vmem:[%s921_s3 + $0x60] sm:$0xff]   ;;  %v245_v29 = vsub.s32 0, %v244_v28  ;;  %v249_v31 = vsub.s32 1, %v244_v28 }
  0x11   : > { %321 = vmatpush1.bf16.msra.mxu0 %v733_v4  ;;  %693 = vmatprep.subr.bf16.mxu1 %v744_v13  ;;  %v747_v16 = vld [vmem:[%s921_s3 + $0x28] sm:$0xff]   ;;  %v749_v18 = vld [vmem:[%s921_s3 + $0x20] sm:$0xff]   ;;  %v750_v19 = vld [vmem:[%s921_s3 + $0x58] sm:$0xff]  }
  0x12   : > { %322 = vmatprep.subr.bf16.mxu0 %v734_v5  ;;  %v751_v20 = vld [vmem:[%s921_s3 + $0x18] sm:$0xff]   ;;  %v752_v21 = vld [vmem:[%s921_s3 + $0x50] sm:$0xff]   ;;  %v754_v23 = vld [vmem:[%s921_s3 + $0x48] sm:$0xff]  }
  0x13   : > { %v753_v22 = vld [vmem:[%s921_s3 + $0x10] sm:$0xff]   ;;  %v755_v24 = vld [vmem:[%s921_s3 + $0x8] sm:$0xff]   ;;  %v756_v25 = vld [vmem:[%s921_s3 + $0x40] sm:$0xff]  }
  0x14   : > { %694 = vmatpush3.bf16.msra.mxu1 %v745_v14  ;;  %v757_v26 = vld [vmem:[%s921_s3] sm:$0xff]  }
  0x15   : > { %323 = vmatpush1.bf16.msra.mxu0 %v736_v6  ;;  %695 = vmatprep.subr.bf16.mxu1 %v746_v15  ;;  %v241_v30 = vld [vmem:[%s920_s2] sm:$0x3] }
  0x16   : > { %324 = vmatprep.subr.bf16.mxu0 %v737_v7  ;;  %v246_v32 = vrot.slane %v241_v30, %v245_v29  ;;  %v250_v33 = vrot.slane %v241_v30, %v249_v31  ;;  %v672_v31 = vld [vmem:[%s922_s4] ss:$0 sm:$0xff] }
  0x18   : > { %696 = vmatpush3.bf16.msra.mxu1 %v747_v16 }
  0x19   : > { %325 = vmatpush1.bf16.msra.mxu0 %v739_v8  ;;  %697 = vmatprep.subr.bf16.mxu1 %v748_v17 }
  0x1c   : > { %670 = vmatmul.mubr.msk.bf16.vlgmr.msra.gmra.mxu0 %vm303_vm0, %v740_v9  ;;  %698 = vmatpush3.bf16.msra.mxu1 %v749_v18 }
  0x1d   : > { %352 = vmatprep.mubr.bf16.mxu0 %v782_v2  ;;  %699 = vmatprep.subr.bf16.mxu1 %v750_v19 }
  0x20   : > { %700 = vmatpush3.bf16.msra.mxu1 %v751_v20 }
  0x21   : > { %701 = vmatprep.subr.bf16.mxu1 %v752_v21 }
  0x24   : > { %671 = vmatmul.mubr.msk.bf16.gmra.mxu0 %vm303_vm0, %v741_v10  ;;  %702 = vmatpush3.bf16.msra.mxu1 %v753_v22 }
  0x25   : > { %703 = vmatprep.subr.bf16.mxu1 %v754_v23 }
  0x28   : > { %704 = vmatpush3.bf16.msra.mxu1 %v755_v24 }
  0x29   : > { %705 = vmatprep.subr.bf16.mxu1 %v756_v25 }
  0x2c   : > { %706 = vmatpush3.bf16.msra.mxu1 %v757_v26 }
  0xdc   : > { %v344_v34 = vpop.f32.mrf.mxu0 }
  0xdd   : > { %v345_v35 = vadd.f32 %v344_v34, %v246_v32 }
  0xde   : > { %v346_v36 = vpop.f32.mrf.mxu0 }
  0xdf   : > { %v347_v37 = vadd.f32 %v346_v36, %v250_v33  ;;  %v371_v38 = vmul.f32 0.70710677, %v345_v35  ;;  %v363_v5 = vmul.f32 0.5, %v345_v35 }
  0xe0   : > { %v348_v39 = vpop.f32.mrf.mxu0 }
  0xe1   : > { %v372_v40 = vmul.f32 0.70710677, %v347_v37  ;;  %v349_v41 = vadd.f32 %v348_v39, %v246_v32  ;;  %v364_v2 = vmul.f32 0.5, %v347_v37 }
  0xe2   : > { %v350_v42 = vpop.f32.mrf.mxu0 }
  0xe3   : > { %758 = verf.f32 %v372_v40  ;;  %v373_v43 = vmul.f32 0.70710677, %v349_v41  ;;  %v351_v44 = vadd.f32 %v350_v42, %v250_v33  ;;  %v365_v1 = vmul.f32 0.5, %v349_v41 }
  0xe4   : > { %760 = verf.f32 %v371_v38  ;;  %v354_v45 = vpop.f32.mrf.mxu0 }
  0xe5   : > { %762 = verf.f32 %v373_v43  ;;  %v374_v46 = vmul.f32 0.70710677, %v351_v44  ;;  %v355_v47 = vadd.f32 %v354_v45, %v246_v32  ;;  %v366_v3 = vmul.f32 0.5, %v351_v44 }
  0xe6   : > { %v356_v48 = vpop.f32.mrf.mxu0 }
  0xe7   : > { %764 = verf.f32 %v374_v46  ;;  %v357_v49 = vadd.f32 %v356_v48, %v250_v33  ;;  %v375_v50 = vmul.f32 0.70710677, %v355_v47  ;;  %v367_v23 = vmul.f32 0.5, %v355_v47 }
  0xe8   : > { %v358_v51 = vpop.f32.mrf.mxu0 }
  0xe9   : > { %v376_v52 = vmul.f32 0.70710677, %v357_v49  ;;  %v359_v53 = vadd.f32 %v358_v51, %v246_v32  ;;  %v368_v20 = vmul.f32 0.5, %v357_v49 }
  0xea   : > { %v360_v54 = vpop.f32.mrf.mxu0 }
  0xeb   : > { %766 = verf.f32 %v376_v52  ;;  %v377_v55 = vmul.f32 0.70710677, %v359_v53  ;;  %v361_v56 = vadd.f32 %v360_v54, %v250_v33  ;;  %v369_v19 = vmul.f32 0.5, %v359_v53 }
  0xec   : > { %768 = verf.f32 %v375_v50 }
  0xed   : > { %770 = verf.f32 %v377_v55  ;;  %v378_v57 = vmul.f32 0.70710677, %v361_v56  ;;  %v370_v21 = vmul.f32 0.5, %v361_v56 }
  0xef   : > { %772 = verf.f32 %v378_v57 }
  0xf0   : > { %v759_v58 = vpop.eup %758 }
  0xf1   : > { %v761_v59 = vpop.eup %760  ;;  %v388_v62 = vadd.f32 1.0, %v759_v58 }
  0xf2   : > { %v763_v60 = vpop.eup %762  ;;  %v387_v0 = vadd.f32 1.0, %v761_v59 }
  0xf3   : > { %v389_v61 = vadd.f32 1.0, %v763_v60  ;;  %v396_v7 = vmul.f32 %v388_v62, %v364_v2 }
  0xf4   : > { %v765_v63 = vpop.eup %764  ;;  %v395_v10 = vmul.f32 %v387_v0, %v363_v5 }
  0xf5   : > { %v390_v4 = vadd.f32 1.0, %v765_v63  ;;  %v397_v6 = vmul.f32 %v389_v61, %v365_v1 }
  0xf7   : > { %v398_v8 = vmul.f32 %v390_v4, %v366_v3  ;;  %v403_v14 = vpack.c.bf16 %v397_v6, %v395_v10 }
  0xf8   : > { %v767_v9 = vpop.eup %766 }
  0xf9   : > { %v769_v11 = vpop.eup %768  ;;  %v404_v12 = vpack.c.bf16 %v398_v8, %v396_v7  ;;  %v392_v15 = vadd.f32 1.0, %v767_v9 }
  0xfa   : > { %v771_v13 = vpop.eup %770  ;;  %v391_v18 = vadd.f32 1.0, %v769_v11 }
  0xfb   : > { %v393_v16 = vadd.f32 1.0, %v771_v13  ;;  %574 = vmatprep.mubr.bf16.mxu1 %v404_v12  ;;  %v400_v25 = vmul.f32 %v392_v15, %v368_v20 }
  0xfc   : > { %v773_v17 = vpop.eup %772  ;;  %575 = vmatmul.mubr.bf16.vlgmr.msra.gmra.mxu1 %v403_v14  ;;  %v399_v27 = vmul.f32 %v391_v18, %v367_v23 }
  0xfd   : > { %v394_v22 = vadd.f32 1.0, %v773_v17  ;;  %v401_v24 = vmul.f32 %v393_v16, %v369_v19 }
  0xff   : > { %v402_v26 = vmul.f32 %v394_v22, %v370_v21  ;;  %v405_v29 = vpack.c.bf16 %v401_v24, %v399_v27 }
 0x101   : > { %v406_v28 = vpack.c.bf16 %v402_v26, %v400_v25 }
 0x103   : > { %582 = vmatprep.mubr.bf16.mxu1 %v406_v28 }
 0x104   : > { %583 = vmatmul.mubr.bf16.gmra.mxu1 %v405_v29 }
 0x1bc   : > { %v707_v30 = vpop.f32.mrf.mxu1 }
 0x1be   : > { %v708_v32 = vpop.f32.mrf.mxu1 }
 0x1bf   : > { %v709_v33 = vadd.f32 %v708_v32, %v707_v30 }
 0x1c0   : > { %v710_v34 = vpop.f32.mrf.mxu1 }
 0x1c1   : > { %v577_v35 = vadd.f32 %v709_v33, %v672_v31 }
 0x1c2   : > { %v711_v36 = vpop.f32.mrf.mxu1 }
 0x1c3   : > { %591 = vst.msk [vmem:[%s226_s9] sm:$0xff] %vm303_vm0, %v577_v35  ;;  %v712_v37 = vadd.f32 %v711_v36, %v710_v34 }
 0x1c4   : > { %v713_v38 = vpop.f32.mrf.mxu1 }
 0x1c5   : > { %v580_v39 = vadd.f32 %v712_v37, %v672_v31 }
 0x1c6   : > { %v714_v40 = vpop.f32.mrf.mxu1 }
 0x1c7   : > { %592 = vst.msk [vmem:[%s226_s9 + $0x8] sm:$0xff] %vm303_vm0, %v580_v39  ;;  %v715_v41 = vadd.f32 %v714_v40, %v713_v38 }
 0x1c8   : > { %v716_v42 = vpop.f32.mrf.mxu1 }
 0x1c9   : > { %v585_v43 = vadd.f32 %v715_v41, %v672_v31 }
 0x1ca   : > { %v717_v44 = vpop.f32.mrf.mxu1 }
 0x1cb   : > { %593 = vst.msk [vmem:[%s226_s9 + $0x10] sm:$0xff] %vm303_vm0, %v585_v43  ;;  %v718_v45 = vadd.f32 %v717_v44, %v716_v42 }
 0x1cd   : > { %v588_v46 = vadd.f32 %v718_v45, %v672_v31 }
 0x1cf   : > { %594 = vst.msk [vmem:[%s226_s9 + $0x18] sm:$0xff] %vm303_vm0, %v588_v46 }
 0x1d0 PF: > { %s15_s18 = sadd.s32 1, %s780_s18  }
 0x1d1   : > { %p12_p4 = scmp.ge.s32.totalorder %s15_s18, 4  }
 0x1d3   :  { %14 = sbr.rel (!%p12_p4) target bundleno = 1 (0x1), region = 70 }

</bundles_post_ra>
